<compile_context>
chip_gen: v7x
topology: tpu7x:2x2x1
jax: 0.10.0
libtpu: 0.0.40
codegen_flags: <defaults>
</compile_context>

<pallas_src>
import numpy as np
import jax
import jax.numpy as jnp
from jax.experimental import pallas as pl
from jax.experimental.pallas import tpu as pltpu

LANE = 128
SUBLANE = 8


def _round_up(x, m):
    return ((x + m - 1) // m) * m


# ----------------------------------------------------------------------------
# Kernels
# ----------------------------------------------------------------------------
def _fused_mlp_kernel(x_ref, w1_ref, b1_ref, w2_ref, b2_ref, w3_ref, b3_ref,
                      out_ref):
    """Block-diagonal fused variant (3 matmuls) — best for small hidden."""
    x = x_ref[...]                                        # (bt, D) compute dtype
    h = jnp.dot(x, w1_ref[...], preferred_element_type=jnp.float32) + b1_ref[...]
    h = jnp.maximum(h, 0.0).astype(w2_ref.dtype)
    h = jnp.dot(h, w2_ref[...], preferred_element_type=jnp.float32) + b2_ref[...]
    h = jnp.maximum(h, 0.0).astype(w3_ref.dtype)
    out = jnp.dot(h, w3_ref[...], preferred_element_type=jnp.float32) + b3_ref[...]
    out_ref[...] = out.astype(out_ref.dtype)


def _split_mlp_kernel(x_ref, w1_ref, b1_ref,
                      sw2_ref, sb2_ref, tw2_ref, tb2_ref,
                      sw3_ref, sb3_ref, tw3_ref, tb3_ref,
                      out_ref):
    """Per-branch layers 2/3 (5 matmuls) — avoids zero MACs at large hidden."""
    Hb = sw2_ref.shape[0]                                  # per-branch padded H
    x = x_ref[...]
    h = jnp.dot(x, w1_ref[...], preferred_element_type=jnp.float32) + b1_ref[...]
    h = jnp.maximum(h, 0.0).astype(sw2_ref.dtype)          # (bt, 2*Hb)
    hs = h[:, :Hb]
    ht = h[:, Hb:]
    hs = jnp.maximum(
        jnp.dot(hs, sw2_ref[...], preferred_element_type=jnp.float32) + sb2_ref[...],
        0.0).astype(sw3_ref.dtype)
    ht = jnp.maximum(
        jnp.dot(ht, tw2_ref[...], preferred_element_type=jnp.float32) + tb2_ref[...],
        0.0).astype(tw3_ref.dtype)
    out_s = jnp.dot(hs, sw3_ref[...], preferred_element_type=jnp.float32) + sb3_ref[...]
    out_t = jnp.dot(ht, tw3_ref[...], preferred_element_type=jnp.float32) + tb3_ref[...]
    out_ref[...] = jnp.concatenate([out_s, out_t], axis=-1).astype(out_ref.dtype)


# ----------------------------------------------------------------------------
# Parameter packing
# ----------------------------------------------------------------------------
def pack_predictor_params(p, input_size, hidden, snum_item, tnum_item,
                          compute_dtype=jnp.bfloat16, split_layer23=None):
    """Packs both branches into lane-dense fused weights.

    split_layer23=None -> auto: block-diagonal for hidden < 256, per-branch
    layer-2/3 matmuls otherwise.  Layer-1 K dim stays unpadded (= input_size).
    """
    if split_layer23 is None:
        split_layer23 = hidden >= 256
    D = input_size

    if not split_layer23:
        Hp = _round_up(2 * hidden, LANE)
        Op = _round_up(snum_item + tnum_item, LANE)

        w1 = jnp.zeros((D, Hp), jnp.float32)
        w1 = w1.at[:, :hidden].set(p["s_w1"])
        w1 = w1.at[:, hidden:2 * hidden].set(p["t_w1"])
        b1 = jnp.zeros((1, Hp), jnp.float32)
        b1 = b1.at[:, :hidden].set(p["s_b1"])
        b1 = b1.at[:, hidden:2 * hidden].set(p["t_b1"])

        w2 = jnp.zeros((Hp, Hp), jnp.float32)              # block-diagonal
        w2 = w2.at[:hidden, :hidden].set(p["s_w2"])
        w2 = w2.at[hidden:2 * hidden, hidden:2 * hidden].set(p["t_w2"])
        b2 = jnp.zeros((1, Hp), jnp.float32)
        b2 = b2.at[:, :hidden].set(p["s_b2"])
        b2 = b2.at[:, hidden:2 * hidden].set(p["t_b2"])

        w3 = jnp.zeros((Hp, Op), jnp.float32)              # block-diag, disjoint cols
        w3 = w3.at[:hidden, :snum_item].set(p["s_w3"])
        w3 = w3.at[hidden:2 * hidden, snum_item:snum_item + tnum_item].set(p["t_w3"])
        b3 = jnp.zeros((1, Op), jnp.float32)
        b3 = b3.at[:, :snum_item].set(p["s_b3"])
        b3 = b3.at[:, snum_item:snum_item + tnum_item].set(p["t_b3"])

        packed = {"w1": w1.astype(compute_dtype), "b1": b1,
                  "w2": w2.astype(compute_dtype), "b2": b2,
                  "w3": w3.astype(compute_dtype), "b3": b3}
        order = ("w1", "b1", "w2", "b2", "w3", "b3")
        dims = dict(mode="fused", input_size=input_size, hidden=hidden,
                    snum_item=snum_item, tnum_item=tnum_item,
                    Op=Op, t_off=snum_item, param_order=order)
        return packed, dims

    # Split variant: per-branch layers 2/3.
    Hb = _round_up(hidden, LANE)
    Osp = _round_up(snum_item, LANE)
    Otp = _round_up(tnum_item, LANE)
    Op = Osp + Otp

    w1 = jnp.zeros((D, 2 * Hb), jnp.float32)
    w1 = w1.at[:, :hidden].set(p["s_w1"])
    w1 = w1.at[:, Hb:Hb + hidden].set(p["t_w1"])
    b1 = jnp.zeros((1, 2 * Hb), jnp.float32)
    b1 = b1.at[:, :hidden].set(p["s_b1"])
    b1 = b1.at[:, Hb:Hb + hidden].set(p["t_b1"])

    def pad2(w, b, rows, cols, rp, cp):
        wp = jnp.zeros((rp, cp), jnp.float32).at[:rows, :cols].set(w)
        bp = jnp.zeros((1, cp), jnp.float32).at[:, :cols].set(b)
        return wp, bp

    sw2, sb2 = pad2(p["s_w2"], p["s_b2"], hidden, hidden, Hb, Hb)
    tw2, tb2 = pad2(p["t_w2"], p["t_b2"], hidden, hidden, Hb, Hb)
    sw3, sb3 = pad2(p["s_w3"], p["s_b3"], hidden, snum_item, Hb, Osp)
    tw3, tb3 = pad2(p["t_w3"], p["t_b3"], hidden, tnum_item, Hb, Otp)

    packed = {"w1": w1.astype(compute_dtype), "b1": b1,
              "sw2": sw2.astype(compute_dtype), "sb2": sb2,
              "tw2": tw2.astype(compute_dtype), "tb2": tb2,
              "sw3": sw3.astype(compute_dtype), "sb3": sb3,
              "tw3": tw3.astype(compute_dtype), "tb3": tb3}
    order = ("w1", "b1", "sw2", "sb2", "tw2", "tb2", "sw3", "sb3", "tw3", "tb3")
    dims = dict(mode="split", input_size=input_size, hidden=hidden,
                snum_item=snum_item, tnum_item=tnum_item,
                Op=Op, t_off=Osp, param_order=order)
    return packed, dims


# ----------------------------------------------------------------------------
# Wrapper
# ----------------------------------------------------------------------------
def _choose_batch_tiling(B, max_tile=1024, min_steps=2):
    """Row tile: multiple of 8 (sublane), <= max_tile, >= min_steps grid steps
    when the batch allows it (so both v7x TensorCores get work)."""
    Bp8 = _round_up(B, SUBLANE)
    steps = max(min_steps, pl.cdiv(Bp8, max_tile))
    bt = _round_up(pl.cdiv(Bp8, steps), SUBLANE)
    grid_m = pl.cdiv(Bp8, bt)
    return bt, bt * grid_m, grid_m


def predictor_forward(x, packed, dims, *, max_batch_tile=1024,
                      compute_dtype=jnp.bfloat16, slab_dtype=jnp.bfloat16,
                      interpret=False):
    """Runs both predictor branches; returns (s_pre, t_pre) in float32."""
    B, D = x.shape
    assert D == dims["input_size"]
    Op = dims["Op"]
    snum, tnum = dims["snum_item"], dims["tnum_item"]

    bt, Bp, grid_m = _choose_batch_tiling(B, max_tile=max_batch_tile)

    # Cast once; pad rows only when the grid requires it.  The feature dim is
    # NOT lane-padded (full-array last-dim block), so no extra HBM pass over x.
    x_c = x.astype(compute_dtype)
    if Bp != B:
        x_c = jnp.pad(x_c, ((0, Bp - B), (0, 0)))

    order = dims["param_order"]
    params = [packed[n] for n in order]

    def const_spec(arr):
        # Grid-invariant block: same VMEM copy reused across all batch tiles
        # (no re-DMA); Buffered(1) -> single VMEM buffer for the weights.
        return pl.BlockSpec(arr.shape, lambda i: (0, 0),
                            pipeline_mode=pl.Buffered(1))

    in_specs = [pl.BlockSpec((bt, D), lambda i: (i, 0))]
    in_specs += [const_spec(a) for a in params]
    out_spec = pl.BlockSpec((bt, Op), lambda i: (i, 0))
    out_shape = jax.ShapeDtypeStruct((Bp, Op), slab_dtype)

    # VMEM budget: double-buffered x/out tiles + single-buffered weights,
    # +50% headroom, floor 16 MiB, cap 48 MiB (below v7x's 64 MiB physical).
    weight_bytes = sum(int(a.size) * np.dtype(a.dtype).itemsize for a in params)
    need = (2 * bt * _round_up(D, LANE) * np.dtype(compute_dtype).itemsize
            + 2 * bt * Op * np.dtype(slab_dtype).itemsize
            + weight_bytes)
    vmem_limit = int(min(48 * 1024 * 1024, max(16 * 1024 * 1024, (3 * need) // 2)))

    kernel = _fused_mlp_kernel if dims["mode"] == "fused" else _split_mlp_kernel

    fn = pl.pallas_call(
        kernel,
        out_shape=out_shape,
        grid_spec=pltpu.PrefetchScalarGridSpec(
            num_scalar_prefetch=0,
            grid=(grid_m,),
            in_specs=in_specs,
            out_specs=out_spec,
        ),
        compiler_params=pltpu.CompilerParams(
            dimension_semantics=("parallel",),   # batch tiles shard across TCs
            vmem_limit_bytes=vmem_limit,
        ),
        interpret=interpret,
    )
    out = fn(x_c, *params)

    # TODO(synk): if downstream (adversarial) losses need full-f32 logits
    # end-to-end, pass slab_dtype=jnp.float32 / compute_dtype=jnp.float32.
    if dims["mode"] == "fused":
        logits = out[:B, :snum + tnum].astype(jnp.float32)   # one pass over slab
        s_pre, t_pre = logits[:, :snum], logits[:, snum:]
    else:
        s_pre = out[:B, :snum].astype(jnp.float32)
        t_pre = out[:B, dims["t_off"]:dims["t_off"] + tnum].astype(jnp.float32)
    return s_pre, t_pre


# ----------------------------------------------------------------------------
# Reference & init
# ----------------------------------------------------------------------------
def init_predictor_params(key, input_size, hidden, snum_item, tnum_item):
    """Deterministic synthetic init (W stored as (in, out), like PyTorch W^T)."""
    keys = jax.random.split(key, 12)

    def linear(kw, kb, fan_in, fan_out):
        bound = 1.0 / jnp.sqrt(fan_in)
        w = jax.random.uniform(kw, (fan_in, fan_out), jnp.float32, -bound, bound)
        b = jax.random.uniform(kb, (1, fan_out), jnp.float32, -bound, bound)
        return w, b

    p = {}
    p["s_w1"], p["s_b1"] = linear(keys[0], keys[1], input_size, hidden)
    p["s_w2"], p["s_b2"] = linear(keys[2], keys[3], hidden, hidden)
    p["s_w3"], p["s_b3"] = linear(keys[4], keys[5], hidden, snum_item)
    p["t_w1"], p["t_b1"] = linear(keys[6], keys[7], input_size, hidden)
    p["t_w2"], p["t_b2"] = linear(keys[8], keys[9], hidden, hidden)
    p["t_w3"], p["t_b3"] = linear(keys[10], keys[11], hidden, tnum_item)
    return p


def _reference_forward(x, p):
    """Pure-JAX f32 reference of the PyTorch module."""
    def mlp(w1, b1, w2, b2, w3, b3):
        h = jnp.maximum(x @ w1 + b1, 0.0)
        h = jnp.maximum(h @ w2 + b2, 0.0)
        return h @ w3 + b3
    s = mlp(p["s_w1"], p["s_b1"], p["s_w2"], p["s_b2"], p["s_w3"], p["s_b3"])
    t = mlp(p["t_w1"], p["t_b1"], p["t_w2"], p["t_b2"], p["t_w3"], p["t_b3"])
    return s, t


if __name__ == "__main__":
    input_size, hidden, snum_item, tnum_item = 32, 32, 10, 12
    batch = 16

    key = jax.random.PRNGKey(0)
    kx, kp = jax.random.split(key)
    x = jax.random.normal(kx, (batch, input_size), dtype=jnp.float32)
    params = init_predictor_params(kp, input_size, hidden, snum_item, tnum_item)
    s_ref, t_ref = _reference_forward(x, params)

    # Path 1: fused block-diagonal layers 2/3 (auto-selected for small hidden).
    packed, dims = pack_predictor_params(params, input_size, hidden,
                                         snum_item, tnum_item)
    s_pre, t_pre = predictor_forward(x, packed, dims)
    jax.block_until_ready((s_pre, t_pre))
    assert s_pre.shape == (batch, snum_item)
    assert t_pre.shape == (batch, tnum_item)
    # bf16 weights/activations/slab with f32 accumulation -> relaxed tolerance.
    assert jnp.allclose(s_pre, s_ref, atol=5e-2, rtol=5e-2), \
        float(jnp.max(jnp.abs(s_pre - s_ref)))
    assert jnp.allclose(t_pre, t_ref, atol=5e-2, rtol=5e-2), \
        float(jnp.max(jnp.abs(t_pre - t_ref)))

    # Path 2: per-branch layers 2/3 (what production hidden >= 256 selects),
    # forced here at the same small shapes to exercise/verify that code path.
    packed_s, dims_s = pack_predictor_params(params, input_size, hidden,
                                             snum_item, tnum_item,
                                             split_layer23=True)
    s2, t2 = predictor_forward(x, packed_s, dims_s)
    jax.block_until_ready((s2, t2))
    assert jnp.allclose(s2, s_ref, atol=5e-2, rtol=5e-2), \
        float(jnp.max(jnp.abs(s2 - s_ref)))
    assert jnp.allclose(t2, t_ref, atol=5e-2, rtol=5e-2), \
        float(jnp.max(jnp.abs(t2 - t_ref)))

    print("KERNEL_OK")
</pallas_src>

<mosaic_0001>
module attributes {stable_mosaic.version = 11 : i64} {
  func.func @_fused_mlp_kernel(%arg0: i32, %arg1: memref<8x32xbf16, #tpu.memory_space<vmem>>, %arg2: memref<32x128xbf16, #tpu.memory_space<vmem>>, %arg3: memref<1x128xf32, #tpu.memory_space<vmem>>, %arg4: memref<128x128xbf16, #tpu.memory_space<vmem>>, %arg5: memref<1x128xf32, #tpu.memory_space<vmem>>, %arg6: memref<128x128xbf16, #tpu.memory_space<vmem>>, %arg7: memref<1x128xf32, #tpu.memory_space<vmem>>, %arg8: memref<8x128xbf16, #tpu.memory_space<vmem>>) attributes {dimension_semantics = [#tpu.dimension_semantics<parallel>], iteration_bounds = array<i64: 2>, scalar_prefetch = 0 : i64, scratch_operands = 0 : i64, tpu.core_type = #tpu.core_type<tc>, window_params = [{transform_indices = @transform_0, window_bounds = array<i64: 8, 32>}, {pipeline_mode = #tpu.pipeline_mode<synchronous>, transform_indices = @transform_1, window_bounds = array<i64: 32, 128>}, {pipeline_mode = #tpu.pipeline_mode<synchronous>, transform_indices = @transform_2, window_bounds = array<i64: 1, 128>}, {pipeline_mode = #tpu.pipeline_mode<synchronous>, transform_indices = @transform_3, window_bounds = array<i64: 128, 128>}, {pipeline_mode = #tpu.pipeline_mode<synchronous>, transform_indices = @transform_4, window_bounds = array<i64: 1, 128>}, {pipeline_mode = #tpu.pipeline_mode<synchronous>, transform_indices = @transform_5, window_bounds = array<i64: 128, 128>}, {pipeline_mode = #tpu.pipeline_mode<synchronous>, transform_indices = @transform_6, window_bounds = array<i64: 1, 128>}, {transform_indices = @transform_7, window_bounds = array<i64: 8, 128>}]} {
    %c0 = arith.constant 0 : index
    %c0_0 = arith.constant 0 : index
    %0 = vector.load %arg1[%c0, %c0_0] : memref<8x32xbf16, #tpu.memory_space<vmem>>, vector<8x32xbf16>
    %c0_1 = arith.constant 0 : index
    %c0_2 = arith.constant 0 : index
    %1 = vector.load %arg2[%c0_1, %c0_2] : memref<32x128xbf16, #tpu.memory_space<vmem>>, vector<32x128xbf16>
    %cst = arith.constant dense<0.000000e+00> : vector<8x128xf32>
    %2 = tpu.matmul %0, %1, %cst {dimension_numbers = #tpu.dot_dimension_numbers<[1], [0], [0], [1], [0, 0, 1, 1], [], []>} : vector<8x32xbf16>, vector<32x128xbf16>, vector<8x128xf32> -> vector<8x128xf32>
    %c0_3 = arith.constant 0 : index
    %c0_4 = arith.constant 0 : index
    %3 = vector.load %arg3[%c0_3, %c0_4] : memref<1x128xf32, #tpu.memory_space<vmem>>, vector<1x128xf32>
    %4 = vector.broadcast %3 : vector<1x128xf32> to vector<8x128xf32>
    %5 = arith.addf %2, %4 : vector<8x128xf32>
    %cst_5 = arith.constant 0.000000e+00 : f32
    %6 = vector.broadcast %cst_5 : f32 to vector<8x128xf32>
    %7 = arith.maximumf %5, %6 : vector<8x128xf32>
    %8 = arith.truncf %7 : vector<8x128xf32> to vector<8x128xbf16>
    %c0_6 = arith.constant 0 : index
    %c0_7 = arith.constant 0 : index
    %9 = vector.load %arg4[%c0_6, %c0_7] : memref<128x128xbf16, #tpu.memory_space<vmem>>, vector<128x128xbf16>
    %cst_8 = arith.constant dense<0.000000e+00> : vector<8x128xf32>
    %10 = tpu.matmul %8, %9, %cst_8 {dimension_numbers = #tpu.dot_dimension_numbers<[1], [0], [0], [1], [0, 0, 1, 1], [], []>} : vector<8x128xbf16>, vector<128x128xbf16>, vector<8x128xf32> -> vector<8x128xf32>
    %c0_9 = arith.constant 0 : index
    %c0_10 = arith.constant 0 : index
    %11 = vector.load %arg5[%c0_9, %c0_10] : memref<1x128xf32, #tpu.memory_space<vmem>>, vector<1x128xf32>
    %12 = vector.broadcast %11 : vector<1x128xf32> to vector<8x128xf32>
    %13 = arith.addf %10, %12 : vector<8x128xf32>
    %cst_11 = arith.constant 0.000000e+00 : f32
    %14 = vector.broadcast %cst_11 : f32 to vector<8x128xf32>
    %15 = arith.maximumf %13, %14 : vector<8x128xf32>
    %16 = arith.truncf %15 : vector<8x128xf32> to vector<8x128xbf16>
    %c0_12 = arith.constant 0 : index
    %c0_13 = arith.constant 0 : index
    %17 = vector.load %arg6[%c0_12, %c0_13] : memref<128x128xbf16, #tpu.memory_space<vmem>>, vector<128x128xbf16>
    %cst_14 = arith.constant dense<0.000000e+00> : vector<8x128xf32>
    %18 = tpu.matmul %16, %17, %cst_14 {dimension_numbers = #tpu.dot_dimension_numbers<[1], [0], [0], [1], [0, 0, 1, 1], [], []>} : vector<8x128xbf16>, vector<128x128xbf16>, vector<8x128xf32> -> vector<8x128xf32>
    %c0_15 = arith.constant 0 : index
    %c0_16 = arith.constant 0 : index
    %19 = vector.load %arg7[%c0_15, %c0_16] : memref<1x128xf32, #tpu.memory_space<vmem>>, vector<1x128xf32>
    %20 = vector.broadcast %19 : vector<1x128xf32> to vector<8x128xf32>
    %21 = arith.addf %18, %20 : vector<8x128xf32>
    %22 = arith.truncf %21 : vector<8x128xf32> to vector<8x128xbf16>
    %c0_17 = arith.constant 0 : index
    %c0_18 = arith.constant 0 : index
    %23 = vector.load %arg8[%c0_17, %c0_18] : memref<8x128xbf16, #tpu.memory_space<vmem>>, vector<8x128xbf16>
    tpu.vector_store %arg8[%c0_17, %c0_18], %22 {strides = array<i32>} : memref<8x128xbf16, #tpu.memory_space<vmem>>, vector<8x128xbf16>,
    return
  }
  func.func @transform_0(%arg0: i32) -> (i32, i32) {
    %c0_i32 = arith.constant 0 : i32
    %c0_i32_0 = arith.constant 0 : i32
    return %arg0, %c0_i32 : i32, i32
  }
  func.func @transform_1(%arg0: i32) -> (i32, i32) {
    %c0_i32 = arith.constant 0 : i32
    %c0_i32_0 = arith.constant 0 : i32
    %c0_i32_1 = arith.constant 0 : i32
    return %c0_i32, %c0_i32_0 : i32, i32
  }
  func.func @transform_2(%arg0: i32) -> (i32, i32) {
    %c0_i32 = arith.constant 0 : i32
    %c0_i32_0 = arith.constant 0 : i32
    %c0_i32_1 = arith.constant 0 : i32
    return %c0_i32, %c0_i32_0 : i32, i32
  }
  func.func @transform_3(%arg0: i32) -> (i32, i32) {
    %c0_i32 = arith.constant 0 : i32
    %c0_i32_0 = arith.constant 0 : i32
    %c0_i32_1 = arith.constant 0 : i32
    return %c0_i32, %c0_i32_0 : i32, i32
  }
  func.func @transform_4(%arg0: i32) -> (i32, i32) {
    %c0_i32 = arith.constant 0 : i32
    %c0_i32_0 = arith.constant 0 : i32
    %c0_i32_1 = arith.constant 0 : i32
    return %c0_i32, %c0_i32_0 : i32, i32
  }
  func.func @transform_5(%arg0: i32) -> (i32, i32) {
    %c0_i32 = arith.constant 0 : i32
    %c0_i32_0 = arith.constant 0 : i32
    %c0_i32_1 = arith.constant 0 : i32
    return %c0_i32, %c0_i32_0 : i32, i32
  }
  func.func @transform_6(%arg0: i32) -> (i32, i32) {
    %c0_i32 = arith.constant 0 : i32
    %c0_i32_0 = arith.constant 0 : i32
    %c0_i32_1 = arith.constant 0 : i32
    return %c0_i32, %c0_i32_0 : i32, i32
  }
  func.func @transform_7(%arg0: i32) -> (i32, i32) {
    %c0_i32 = arith.constant 0 : i32
    %c0_i32_0 = arith.constant 0 : i32
    return %arg0, %c0_i32 : i32, i32
  }
}

</mosaic_0001>

<bundles_post_ra>
// kernel: tpu_custom_call.1
= control target key start
LH: loop header
LB: loop body
LE: loop exit
PB: predicated region body
PF: predicated region fallthrough
CT: control target
= control target key end

     0   :  { %12 = vsyncpa [#allocation3], 0  ;;  %s1495_s0 = inlined_call_operand.hbm [shape: bf16[16,32], index: 0, kind: input, shape index: {}]   ;;  %s1496_s1 = inlined_call_operand.hbm [shape: bf16[32,128], index: 1, kind: input, shape index: {}]   ;;  %s1497_s2 = inlined_call_operand.vmem [shape: f32[1,128], index: 2, kind: input, shape index: {}]   ;;  %s1498_s3 = inlined_call_operand.hbm [shape: bf16[128,128], index: 3, kind: input, shape index: {}]   ;;  %s1499_s4 = inlined_call_operand.vmem [shape: f32[1,128], index: 4, kind: input, shape index: {}]   ;;  %s1500_s5 = inlined_call_operand.hbm [shape: bf16[128,128], index: 5, kind: input, shape index: {}]   ;;  %s1501_s6 = inlined_call_operand.vmem [shape: f32[1,128], index: 6, kind: input, shape index: {}]   ;;  %s1502_s7 = inlined_call_operand.hbm [shape: bf16[16,128], index: 7, kind: output, shape index: {}]  }
   0x1   :  { %14 = vsyncpa [#allocation3 + $0x1], 0 }
   0x2   :  { %15 = vsyncpa [#allocation6], 0 }
   0x3   :  { %16 = vsyncpa [#allocation9], 0 }
   0x4   :  { %17 = vsyncpa [#allocation4], 0 }
   0x5   :  { %19 = vsyncpa [#allocation4 + $0x1], 0  ;;  %s1195_s24 = smov 0   ;;  %s1197_s25 = smov 0  }
   0x6   :  { %s1199_s26 = smov 0   ;;  %s1201_s27 = smov 0  }
   0x7 LB: > { %s1216_s28 = sadd.s32 4294967295, %s1144_s27   ;;  %s748_s29 = sadd.s32 4294967294, %s1144_s27   ;;  %s1144_s27 = sphi %s1201_s27, %s1528_s27   ;;  %s1140_s26 = sphi %s1199_s26, %s1527_s26   ;;  %s1136_s25 = sphi %s1197_s25, %s1526_s25   ;;  %s1132_s24 = sphi %s1195_s24, %s1525_s24  }
   0x8   : > { %p45_p0 = scmp.ne.s32.totalorder %s1136_s25, %s1132_s24  ;;  %p1503_p1 = scmp.eq.s32.totalorder %s1216_s28, 0 }
   0x9   : > { %p201_p3 = scmp.eq.s32.totalorder %s748_s29, 1  ;;  %p749_p5 = scmp.ge.s32.totalorder %s1144_s27, 1 }
   0xa   : > { %p1225_p4 = por %p1503_p1, %p45_p0  ;;  %p208_p7 = scmp.lt.s32.totalorder %s1144_s27, 3 }
   0xb   : > { %p1230_p6 = por %p201_p3, %p45_p0  ;;  %s1146_s10 = smov [#allocation5]  }
   0xc   : > { %s1507_s30 = scalar_select %p1225_p4, 1, 0 }
   0xd   : > { %s1508_s8 = scalar_select %p1230_p6, 1, 0 }
   0xe   : > { %p1235_p8 = pnand %p749_p5, %p208_p7  ;;  %s220_s11 = sshll.u32 %s1146_s10, 4  ;;  %s1239_s11 = int_to_ptr.vmem [resolvable:$true] %s220_s11 }
   0xf   : > { %1509 = sst [smem:[#allocation15_spill]] %s1508_s8  ;;  %s1147_s13 = smov [#allocation7]  }
  0x10   : > { %s1510_s9 = scalar_select %p1235_p8, 1, 0 }
  0x11   : > { %p873_p9 = pneg %p1235_p8  ;;  %s236_s14 = sshll.u32 %s1147_s13, 4  ;;  %s1250_s14 = int_to_ptr.vmem [resolvable:$true] %s236_s14 }
  0x12   : > { %s1148_s15 = smov [#allocation8]   ;;  %s956_s19 = scalar_lea.hbm %s1496_s1, 256 }
  0x13   : > { %p1246_p11 = pnand %p873_p9, %p1503_p1  ;;  %s1252_s16 = sshll.u32 %s1148_s15, 4  ;;  %s253_s16 = int_to_ptr.vmem [resolvable:$true] %s1252_s16 }
  0x14   : > { %p957_p12 = scmp.ne.s32.totalorder %s1496_s1, %s956_s19  ;;  %p963_p5 = scmp.lt.u32.totalorder %s956_s19, %s1496_s1 }
  0x15   : > { %p1262_p13 = pneg %p1246_p11 }
  0x17   : > { %p959_p0 = pnand %p1262_p13, %p957_p12 }
  0x19   : > { %p960_p3 = pneg %p959_p0 }
  0x1b   : > { %p965_p7 = pnand %p963_p5, %p960_p3 }
  0x1d   : > { %968 = shalt.err (!%p965_p7)
}
  0x1e   : > { %s969_s10 = scalar_lea.vmem %s1239_s11, 256  ;;  %p977_p2 = scmp.lt.s32.totalorder %s1239_s11, %s1239_s11 }
  0x1f   : > { %p970_p9 = scmp.ne.s32.totalorder %s1239_s11, %s969_s10  ;;  %p978_p6 = scmp.lt.s32.totalorder %s969_s10, %s969_s10 }
  0x21   : > { %p972_p10 = pnand %p970_p9, %p1262_p13  ;;  %p979_p12 = por %p978_p6, %p977_p2 }
  0x23   : > { %p973_p1 = pneg %p972_p10 }
  0x25   : > { %p980_p0 = pnand %p979_p12, %p973_p1 }
  0x27   : > { %983 = shalt.err (!%p980_p0)
}
  0x28   : > { %s1149_s13 = smov 64   ;;  %s1150_s15 = smov 4  }
  0x29   : > { %876 = dma.hbm_to_vmem [thread:$0]  (!%p1246_p11), %s1496_s1, 256, %s1239_s11, [#allocation6], %s1149_s13, %s1149_s13, %s1150_s15  }
  0x2a   : > { %s984_s21 = scalar_lea.hbm %s1498_s3, 1024 }
  0x2b   : > { %p985_p1 = scmp.ne.s32.totalorder %s1498_s3, %s984_s21  ;;  %p991_p10 = scmp.lt.u32.totalorder %s984_s21, %s1498_s3 }
  0x2d   : > { %p987_p2 = pnand %p985_p1, %p1262_p13 }
  0x2f   : > { %p988_p6 = pneg %p987_p2 }
  0x31   : > { %p993_p3 = pnand %p991_p10, %p988_p6 }
  0x33   : > { %996 = shalt.err (!%p993_p3)
}
  0x34   : > { %s997_s11 = scalar_lea.vmem %s1250_s14, 1024  ;;  %p1005_p12 = scmp.lt.s32.totalorder %s1250_s14, %s1250_s14 }
  0x35   : > { %p998_p5 = scmp.ne.s32.totalorder %s1250_s14, %s997_s11  ;;  %p1006_p0 = scmp.lt.s32.totalorder %s997_s11, %s997_s11 }
  0x37   : > { %p1000_p7 = pnand %p998_p5, %p1262_p13  ;;  %p1007_p1 = por %p1006_p0, %p1005_p12 }
  0x39   : > { %p1001_p9 = pneg %p1000_p7 }
  0x3b   : > { %p1008_p2 = pnand %p1007_p1, %p1001_p9 }
  0x3d   : > { %1011 = shalt.err (!%p1008_p2)
}
  0x3e   : > { %879 = dma.hbm_to_vmem [thread:$0]  (!%p1246_p11), %s1498_s3, 1024, %s1250_s14, [#allocation6], %s1149_s13, %s1149_s13, %s1150_s15  }
  0x3f   : > { %s1012_s20 = scalar_lea.hbm %s1500_s5, 1024 }
  0x40   : > { %p1013_p6 = scmp.ne.s32.totalorder %s1500_s5, %s1012_s20  ;;  %p1019_p5 = scmp.lt.u32.totalorder %s1012_s20, %s1500_s5 }
  0x42   : > { %p1015_p10 = pnand %p1013_p6, %p1262_p13 }
  0x44   : > { %p1016_p3 = pneg %p1015_p10 }
  0x46   : > { %p1021_p7 = pnand %p1019_p5, %p1016_p3 }
  0x48   : > { %1024 = shalt.err (!%p1021_p7)
}
  0x49   : > { %s1025_s11 = scalar_lea.vmem %s253_s16, 1024  ;;  %p1033_p1 = scmp.lt.s32.totalorder %s253_s16, %s253_s16 }
  0x4a   : > { %p1026_p9 = scmp.ne.s32.totalorder %s253_s16, %s1025_s11  ;;  %p1034_p2 = scmp.lt.s32.totalorder %s1025_s11, %s1025_s11 }
  0x4c   : > { %p1028_p12 = pnand %p1026_p9, %p1262_p13  ;;  %p1035_p4 = por %p1034_p2, %p1033_p1 }
  0x4e   : > { %p1029_p0 = pneg %p1028_p12 }
  0x50   : > { %p1036_p8 = pnand %p1035_p4, %p1029_p0 }
  0x52   : > { %1039 = shalt.err (!%p1036_p8)
}
  0x53   : > { %882 = dma.hbm_to_vmem [thread:$0]  (!%p1246_p11), %s1500_s5, 1024, %s253_s16, [#allocation9], %s1149_s13, %s1149_s13, %s1150_s15  }
  0x54   : > { %s1335_s22 = sadd.s32 1, %s1144_s27   ;;  %s32_s17 = sadd.s32 1, %s1140_s26 }
  0x55   : > { %s29_s12 = ssub.s32 %s1144_s27, %s1335_s22  ;;  %p39_p8 = scmp.ne.s32.totalorder %s1140_s26, %s1136_s25 }
  0x56   : > { %p30_p4 = scmp.eq.s32.totalorder %s29_s12, 0  ;;  %p40_p13 = scmp.eq.s32.totalorder %s1144_s27, 0 }
  0x57   : > { %p894_p6 = scmp.lt.s32.totalorder %s1144_s27, 2  ;;  %p1513_p3 = scmp.eq.s32.totalorder %s1216_s28, 1 }
  0x58   : > { %s1345_s18 = scalar_select %p30_p4, %s1140_s26, %s32_s17  }
  0x59   : > { %p41_p10 = por %p40_p13, %p39_p8  ;;  %p1349_p5 = por %p1513_p3, %p39_p8 }
  0x5a   : > { %s269_s20 = sand.u32 1, %s1140_s26   ;;  %s755_s21 = sshll.u32 %s1144_s27, 6 }
  0x5b   : > { %s754_s16 = sshll.u32 %s269_s20, 2  ;;  %s1358_s23 = scalar_lea.hbm %s1495_s0, %s755_s21 }
  0x5c   : > { %s273_s29 = scalar_lea.vmem [#allocation2], %s754_s16  ;;  %p1360_p11 = pnand %p894_p6, %p41_p10 }
  0x5d   : > { %s280_s10 = sshll.u32 %s273_s29, 4  ;;  %s270_s14 = scalar_lea.sflag [#allocation3], %s269_s20  ;;  %s1364_s10 = int_to_ptr.vmem [resolvable:$true] %s280_s10 }
  0x5e   : > { %s1040_s8 = scalar_lea.hbm %s1358_s23, 64  ;;  %p1042_p9 = pneg %p1360_p11 }
  0x5f   : > { %p1041_p7 = scmp.ne.s32.totalorder %s1358_s23, %s1040_s8  ;;  %s1045_s21 = scalar_lea.hbm %s1495_s0, 128 }
  0x60   : > { %p1046_p1 = scmp.lt.u32.totalorder %s1358_s23, %s1495_s0  ;;  %p1047_p2 = scmp.lt.u32.totalorder %s1045_s21, %s1040_s8 }
  0x61   : > { %p1043_p12 = pnand %p1042_p9, %p1041_p7  ;;  %p1049_p8 = scmp.lt.u32.totalorder %s1040_s8, %s1358_s23 }
  0x62   : > { %p1048_p4 = por %p1047_p2, %p1046_p1 }
  0x63   : > { %p1044_p0 = pneg %p1043_p12 }
  0x64   : > { %p1050_p13 = por %p1049_p8, %p1048_p4 }
  0x66   : > { %p1051_p6 = pnand %p1050_p13, %p1044_p0 }
  0x68   : > { %1054 = shalt.err (!%p1051_p6)
}
  0x69   : > { %s1055_s20 = scalar_lea.vmem %s1364_s10, 64  ;;  %s1151_s15 = smov [#allocation2]  }
  0x6a   : > { %p1056_p10 = scmp.ne.s32.totalorder %s1364_s10, %s1055_s20  ;;  %s1060_s29 = sshll.u32 %s1151_s15, 4  ;;  %s1061_s29 = int_to_ptr.vmem [resolvable:$false] %s1060_s29 }
  0x6b   : > { %s1062_s12 = scalar_lea.vmem %s1061_s29, 128  ;;  %p1063_p12 = scmp.lt.s32.totalorder %s1364_s10, %s1061_s29 }
  0x6c   : > { %p1058_p3 = pnand %p1056_p10, %p1042_p9  ;;  %p1064_p1 = scmp.lt.s32.totalorder %s1062_s12, %s1055_s20 }
  0x6e   : > { %p1059_p7 = pneg %p1058_p3  ;;  %p1065_p2 = por %p1064_p1, %p1063_p12 }
  0x70   : > { %p1066_p4 = pnand %p1065_p2, %p1059_p7 }
  0x72   : > { %1069 = shalt.err (!%p1066_p4)
}
  0x73   : > { %886 = dma.hbm_to_vmem [thread:$0]  (!%p1360_p11), %s1358_s23, 64, %s1364_s10, %s270_s14  }
  0x74   : > { %p1516_p0 = scmp.ne.s32.totalorder %s1510_s9, 0 }
  0x75   : > { %s1394_s8 = sand.u32 (!%p1516_p0), 1, %s1136_s25   ;;  %p1517_p9 = scmp.ne.s32.totalorder (!%p1516_p0), %s1507_s30, 0 }
  0x76   : > { %289 = sbr.rel (%p1516_p0) target bundleno = 809 (0x329), region = 48  ;;  %s757_s17 = sshll.u32 (!%p1516_p0), %s1394_s8, 2 }
  0x77   : > { %s292_s21 = scalar_lea.sflag (!%p1516_p0), [#allocation3], %s1394_s8  ;;  %s295_s16 = scalar_lea.vmem (!%p1516_p0), [#allocation2], %s757_s17 }
  0x7d   : > { %1115 = dma.done.wait (%p1517_p9), %s292_s21, 64  }
  0x7e   : > { %1117 = vsyncadd (%p1517_p9), %s292_s21, 4294967232  ;;  %p1518_p11 = scmp.eq.s32.totalorder %s1216_s28, 0 }
  0x80   : > { %1119 = dma.done.wait (%p1518_p11), [#allocation6], 1280   ;;  %p1519_p8 = pmov %p1518_p11 }
  0x82   : > { %1121 = vsyncadd (%p1519_p8), [#allocation6], 4294966016  ;;  %p1520_p13 = pmov %p1519_p8 }
  0x83   : > { %p1521_p6 = pmov %p1519_p8 }
  0x84   : > { %1123 = dma.done.wait (%p1520_p13), [#allocation9], 1024  }
  0x85   : > { %1125 = vsyncadd (%p1521_p6), [#allocation9], 4294966272  ;;  %v1152_v0 = vmov 0.0   ;;  %vm1153_vm0 = vmmov 0   ;;  %v938_v1 = vld [vmem:[#allocation5] sm:$0xff]   ;;  %v939_v2 = vld [vmem:[#allocation5 + $0x8] sm:$0xff]  }
  0x86   : > { %809 = vmatprep.subr.bf16.mxu0 %v1152_v0  ;;  %813 = vmatprep.mubr.msk.bf16.mxu0 %vm1153_vm0, %v1152_v0  ;;  %v940_v3 = vld [vmem:[#allocation7] sm:$0xff]   ;;  %vm363_vm1 = vcmask 261120   ;;  %v941_v4 = vld [vmem:[#allocation7 + $0x8] sm:$0xff]   ;;  %v942_v6 = vld [vmem:[#allocation7 + $0x10] sm:$0xff]   ;;  %s785_s13 = sshll.u32 %s1216_s28, 6  ;;  %s337_s20 = scalar_lea.vmem [#allocation10], %s757_s17 }
  0x87   : > { %817 = vmatprep.subr.bf16.mxu1 %v1152_v0  ;;  %833 = vmatprep.mubr.msk.bf16.mxu1 %vm1153_vm0, %v1152_v0  ;;  %v339_v5 = vld [vmem:[%s295_s16] sm:$0xf]  ;;  %v943_v7 = vld [vmem:[#allocation7 + $0x18] sm:$0xff]   ;;  %v944_v8 = vld [vmem:[#allocation7 + $0x20] sm:$0xff]   ;;  %s649_s15 = sshll.u32 %s337_s20, 4  ;;  %s1451_s21 = scalar_lea.hbm %s1502_s7, %s785_s13  ;;  %s1453_s15 = int_to_ptr.vmem [resolvable:$true] %s649_s15 }
  0x88   : > { %810 = vmatpush3.bf16.msra.mxu0 %v938_v1  ;;  %818 = vmatpush3.bf16.msra.mxu1 %v940_v3  ;;  %v945_v9 = vld [vmem:[#allocation7 + $0x28] sm:$0xff]   ;;  %v946_v10 = vld [vmem:[#allocation7 + $0x30] sm:$0xff]   ;;  %v947_v11 = vld [vmem:[#allocation7 + $0x38] sm:$0xff]   ;;  %s636_s28 = scalar_lea.sflag [#allocation4], %s1394_s8  ;;  %s1070_s16 = scalar_lea.vmem %s1453_s15, 64 }
  0x89   : > { %811 = vmatprep.subr.bf16.mxu0 %v1152_v0  ;;  %819 = vmatprep.subr.bf16.mxu1 %v1152_v0  ;;  %v948_v12 = vld [vmem:[#allocation8] sm:$0xff]   ;;  %v949_v13 = vld [vmem:[#allocation8 + $0x8] sm:$0xff]   ;;  %v950_v14 = vld [vmem:[#allocation8 + $0x10] sm:$0xff]   ;;  %p1071_p10 = scmp.ne.s32.totalorder %s1453_s15, %s1070_s16  ;;  %s1154_s17 = smov [#allocation10]  }
  0x8a   : > { %v951_v15 = vld [vmem:[#allocation8 + $0x18] sm:$0xff]   ;;  %v952_v16 = vld [vmem:[#allocation8 + $0x20] sm:$0xff]   ;;  %v953_v17 = vld [vmem:[#allocation8 + $0x28] sm:$0xff]   ;;  %s1074_s30 = sshll.u32 %s1154_s17, 4  ;;  %s1075_s30 = int_to_ptr.vmem [resolvable:$false] %s1074_s30 }
  0x8b   : > { %v762_v18 = vld [vmem:[%s1497_s2] ss:$0 sm:$0xff]  ;;  %v954_v26 = vld [vmem:[#allocation8 + $0x30] sm:$0xff]   ;;  %v955_v27 = vld [vmem:[#allocation8 + $0x38] sm:$0xff]   ;;  %p1072_p3 = pnand %p1071_p10, %p1349_p5  ;;  %s1076_s9 = scalar_lea.vmem %s1075_s30, 128 }
  0x8c   : > { %812 = vmatpush3.bf16.msra.mxu0 %v939_v2  ;;  %820 = vmatpush3.bf16.msra.mxu1 %v941_v4  ;;  %v766_v28 = vld [vmem:[%s1499_s4] ss:$0 sm:$0xff]  ;;  %p1077_p12 = scmp.lt.s32.totalorder %s1453_s15, %s1075_s30  ;;  %p1078_p1 = scmp.lt.s32.totalorder %s1076_s9, %s1070_s16 }
  0x8d   : > { %837 = vmatprep.subr.bf16.mxu0 %v1152_v0  ;;  %821 = vmatprep.subr.bf16.mxu1 %v1152_v0  ;;  %v775_v36 = vld [vmem:[%s1501_s6] ss:$0 sm:$0xff]  ;;  %p1073_p7 = pneg %p1072_p3 }
  0x8e   : > { %p1079_p2 = por %p1078_p1, %p1077_p12 }
  0x8f   : > { %814 = vmatmul.mubr.msk.bf16.vlgmr.msra.gmra.mrb[0].mxu0 %vm363_vm1, %v339_v5 }
  0x90   : > { %853 = vmatprep.mubr.msk.bf16.mxu0 %vm1153_vm0, %v1152_v0  ;;  %822 = vmatpush3.bf16.msra.mxu1 %v942_v6  ;;  %p1080_p4 = pnand %p1079_p2, %p1073_p7 }
  0x91   : > { %823 = vmatprep.subr.bf16.mxu1 %v1152_v0  ;;  %838 = vmatpush3.bf16.msra.mxu0 %v948_v12 }
  0x92   : > { %839 = vmatprep.subr.bf16.mxu0 %v1152_v0 }
  0x94   : > { %824 = vmatpush3.bf16.msra.mxu1 %v943_v7 }
  0x95   : > { %825 = vmatprep.subr.bf16.mxu1 %v1152_v0  ;;  %840 = vmatpush3.bf16.msra.mxu0 %v949_v13 }
  0x96   : > { %841 = vmatprep.subr.bf16.mxu0 %v1152_v0 }
  0x98   : > { %826 = vmatpush3.bf16.msra.mxu1 %v944_v8 }
  0x99   : > { %827 = vmatprep.subr.bf16.mxu1 %v1152_v0  ;;  %842 = vmatpush3.bf16.msra.mxu0 %v950_v14 }
  0x9a   : > { %843 = vmatprep.subr.bf16.mxu0 %v1152_v0 }
  0x9c   : > { %828 = vmatpush3.bf16.msra.mxu1 %v945_v9 }
  0x9d   : > { %829 = vmatprep.subr.bf16.mxu1 %v1152_v0  ;;  %844 = vmatpush3.bf16.msra.mxu0 %v951_v15 }
  0x9e   : > { %845 = vmatprep.subr.bf16.mxu0 %v1152_v0 }
  0xa0   : > { %830 = vmatpush3.bf16.msra.mxu1 %v946_v10 }
  0xa1   : > { %831 = vmatprep.subr.bf16.mxu1 %v1152_v0  ;;  %846 = vmatpush3.bf16.msra.mxu0 %v952_v16 }
  0xa2   : > { %847 = vmatprep.subr.bf16.mxu0 %v1152_v0 }
  0xa4   : > { %832 = vmatpush3.bf16.msra.mxu1 %v947_v11 }
  0xa5   : > { %848 = vmatpush3.bf16.msra.mxu0 %v953_v17 }
  0xa6   : > { %849 = vmatprep.subr.bf16.mxu0 %v1152_v0 }
  0xa9   : > { %850 = vmatpush3.bf16.msra.mxu0 %v954_v26 }
  0xaa   : > { %851 = vmatprep.subr.bf16.mxu0 %v1152_v0 }
  0xad   : > { %852 = vmatpush3.bf16.msra.mxu0 %v955_v27 }
 0x162   : > { %v401_v19 = vpop.f32.mrb[0].mxu0 }
 0x163   : > { %v402_v20 = vadd.f32 %v762_v18, %v401_v19  ;;  %v815_v21 = vpop.f32.mrb[1].mxu0 }
 0x164   : > { %v404_v22 = vpop.f32.mrb[2].mxu0 }
 0x165   : > { %v407_v23 = vmax.f32 %v402_v20, 0.0  ;;  %v816_v24 = vpop.f32.mrb[3].mxu0 }
 0x167   : > { %v408_v25 = vpack.c.bf16 %v407_v23, %v407_v23 }
 0x169   : > { %834 = vmatmul.mubr.bf16.vlgmr.msra.gmra.mrb[0].mxu1 %v408_v25 }
 0x23c   : > { %v514_v29 = vpop.f32.mrb[0].mxu1 }
 0x23d   : > { %v515_v30 = vadd.f32 %v766_v28, %v514_v29  ;;  %v835_v31 = vpop.f32.mrb[1].mxu1 }
 0x23e   : > { %v517_v32 = vpop.f32.mrb[2].mxu1 }
 0x23f   : > { %v520_v33 = vmax.f32 %v515_v30, 0.0  ;;  %v836_v34 = vpop.f32.mrb[3].mxu1 }
 0x241   : > { %v521_v35 = vpack.c.bf16 %v520_v33, %v520_v33 }
 0x243   : > { %854 = vmatmul.mubr.bf16.vlgmr.msra.gmra.mrb[4].mxu0 %v521_v35 }
 0x316   : > { %v627_v37 = vpop.f32.mrb[4].mxu0 }
 0x317   : > { %v628_v38 = vadd.f32 %v775_v36, %v627_v37  ;;  %v855_v39 = vpop.f32.mrb[5].mxu0 }
 0x318   : > { %v630_v40 = vpop.f32.mrb[6].mxu0 }
 0x319   : > { %v633_v41 = vpack.c.bf16 %v628_v38, %v628_v38  ;;  %v856_v42 = vpop.f32.mrb[7].mxu0 }
 0x31b   : > { %634 = vst [vmem:[%s337_s20] sm:$0xf] %v633_v41 }
 0x31c   : > { %1083 = shalt.err (!%p1080_p4)
}
 0x31d   : > { %s1084_s8 = scalar_lea.hbm %s1451_s21, 64  ;;  %s1088_s11 = scalar_lea.hbm %s1502_s7, 128 }
 0x31e   : > { %p1085_p0 = scmp.ne.s32.totalorder %s1451_s21, %s1084_s8  ;;  %p1089_p8 = scmp.lt.u32.totalorder %s1451_s21, %s1502_s7 }
 0x31f   : > { %p1090_p13 = scmp.lt.u32.totalorder %s1088_s11, %s1084_s8  ;;  %p1092_p10 = scmp.lt.u32.totalorder %s1084_s8, %s1451_s21 }
 0x320   : > { %p1086_p9 = pnand %p1085_p0, %p1349_p5 }
 0x321   : > { %p1091_p6 = por %p1090_p13, %p1089_p8 }
 0x322   : > { %p1087_p11 = pneg %p1086_p9 }
 0x323   : > { %p1093_p3 = por %p1092_p10, %p1091_p6 }
 0x325   : > { %p1094_p7 = pnand %p1093_p3, %p1087_p11 }
 0x327   : > { %1097 = shalt.err (!%p1094_p7)
}
 0x328   : > { %871 = dma.vmem_to_hbm [thread:$0]  (%p1349_p5), %s1453_s15, 64, %s1451_s21, %s636_s28  }
 0x329 PF: > { %s1522_s20 = sld [smem:[#allocation15_spill]]  ;;  %s661_s29 = sand.u32 1, %s1132_s24  }
 0x32a   : > { %p1524_p1 = scmp.ge.s32.totalorder %s1144_s27, 2  ;;  %s662_s12 = scalar_lea.sflag [#allocation4], %s661_s29 }
 0x32f   : > { %p1523_p12 = scmp.ne.s32.totalorder %s1522_s20, 0 }
 0x331   : > { %p888_p2 = pnand %p1524_p1, %p1523_p12 }
 0x333   : > { %1127 = dma.done.wait (!%p888_p2), %s662_s12, 64  }
 0x334   : > { %1129 = vsyncadd (!%p888_p2), %s662_s12, 4294967232  ;;  %p22_p4 = scmp.ge.s32.totalorder %s1335_s22, 4   ;;  %s1525_s24 = smov %s1136_s25 }
 0x335   : > { %s1526_s25 = smov %s1140_s26  ;;  %s1527_s26 = smov %s1345_s18 }
 0x336   : > { %s1528_s27 = smov %s1335_s22  ;;  %24 = sbr.rel (!%p22_p4) target bundleno = 7 (0x7), region = 105 }
 0x33d   :  { %667 = vsyncpa [#allocation3], 1 }
 0x33e   :  { %669 = vsyncpa [#allocation3 + $0x1], 1 }
 0x33f   :  { %670 = vsyncpa [#allocation6], 1 }
 0x340   :  { %671 = vsyncpa [#allocation9], 1 }
 0x341   :  { %672 = vsyncpa [#allocation4], 1 }
 0x342   :  { %674 = vsyncpa [#allocation4 + $0x1], 1 }

</bundles_post_ra>
